<compile_context>
chip_gen: v7x
topology: tpu7x:2x2x1
jax: 0.10.0
libtpu: 0.0.40
codegen_flags: <defaults>
</compile_context>

<pallas_src>
import math
import jax
import jax.numpy as jnp
from jax.experimental import pallas as pl
from jax.experimental.pallas import tpu as pltpu


def _round_up(n, m):
    return ((n + m - 1) // m) * m


def mlp_kernel(x_ref, w1_ref, b1_ref, w2_ref, b2_ref, w3_ref, b3_ref, o_ref):
    """Fused Linear->ReLU->Linear->ReLU->Linear for one batch tile.

    x_ref : (bt, D)   f32 (native dtype streamed from HBM)
    w1_ref: (D, 64)   bf16 or f32 (constant block, fetched once)
    b1_ref: (1, 64)   f32
    w2_ref: (64, 32)  f32
    b2_ref: (1, 32)   f32
    w3_ref: (1, 32)   f32 (row form of the (32, 1) weight)
    b3_ref: (1, 1)    f32
    o_ref : (1, bt)   f32 (lane-dense: batch on the lane axis)
    """
    x = x_ref[...]
    if w1_ref.dtype == jnp.bfloat16:
        # In-kernel cast: HBM still streams x exactly once at 4 B/elem; the
        # convert is VPU work hidden under the x DMA.
        x = x.astype(jnp.bfloat16)

    # Layer 1 (D -> 64): MXU matmul, f32 accumulate, f32 bias + ReLU.
    h1 = jnp.dot(x, w1_ref[...], preferred_element_type=jnp.float32) + b1_ref[...]
    h1 = jnp.maximum(h1, 0.0)

    # Layer 2 (64 -> 32), f32 throughout.
    h2 = jnp.dot(h1, w2_ref[...], preferred_element_type=jnp.float32) + b2_ref[...]
    h2 = jnp.maximum(h2, 0.0)

    # Layer 3 (Linear(32, 1)): contract the 32-dim of h2 against the (1, 32)
    # row form of w3 so the result is a lane-dense (1, bt) row -> full-width
    # vector stores instead of masked width-1 column stores.  (Any XLU
    # transpose Mosaic inserts for this is free here: the XLU is otherwise
    # idle and the kernel is DMA-bound.)
    y = jax.lax.dot_general(
        w3_ref[...], h2,
        dimension_numbers=(((1,), (1,)), ((), ())),
        preferred_element_type=jnp.float32)                     # (1, bt)
    o_ref[...] = (y + b3_ref[...]).astype(o_ref.dtype)


def _choose_batch_tile(B, D, use_bf16):
    """Largest batch tile that fits a conservative VMEM budget; for large B
    guarantee >= 2 tiles so both v7x TensorCores get work."""
    if B <= 1024:
        return B                        # single tile; block dims == array dims

    lane_d = _round_up(max(D, 128), 128)
    # VMEM bytes per batch row in the pipeline:
    per_row = 2 * lane_d * 4            # double-buffered f32 x block (lane-padded)
    if use_bf16:
        per_row += lane_d * 2           # in-kernel bf16 copy of the x tile
    per_row += 2 * 128 * 4              # h1/h2 f32 intermediates (lane-padded)
    per_row += 256                      # slack (output rows, temporaries)

    budget = 24 * 1024 * 1024           # safe under every generation's VMEM cap
    budget -= 2 * D * 128 * (2 if use_bf16 else 4)   # double-buffered w1 block
    budget = max(budget, 4 * 1024 * 1024)

    cap = max((budget // per_row) // 128 * 128, 128)
    # At least two tiles so dimension_semantics=("parallel",) can span both
    # TensorCores on v7x.
    tile = min(cap, _round_up(pl.cdiv(B, 2), 128))
    return max(tile, 128)


def simple_regression_nn(x, params, *, batch_tile=None, use_bf16=True):
    """Forward pass of SimpleRegressionNN via a single fused Pallas kernel.

    x: [B, input_dim] float32
    params: dict with w1 [D,64], b1 [1,64], w2 [64,32], b2 [1,32],
            w3 [32,1], b3 [1,1]   (all float32)
    returns: [B, 1] float32
    """
    B, D = x.shape
    w1, b1 = params["w1"], params["b1"]
    w2, b2 = params["w2"], params["b2"]
    w3, b3 = params["w3"], params["b3"]
    H1, H2 = w1.shape[1], w2.shape[1]

    if batch_tile is None:
        batch_tile = _choose_batch_tile(B, D, use_bf16)
    elif batch_tile >= B:
        batch_tile = B
    else:
        batch_tile = _round_up(batch_tile, 128)
    num_tiles = pl.cdiv(B, batch_tile)

    # x stays in its native f32 (the kernel is HBM-bound on streaming x; a
    # wrapper-side convert would add a full extra read+write).  Only w1,
    # fetched once per kernel, is pre-cast when use_bf16=True.
    w1 = w1.astype(jnp.bfloat16 if use_bf16 else jnp.float32)
    w2 = w2.astype(jnp.float32)
    w3_row = w3.astype(jnp.float32).reshape(1, -1)   # (32, 1) -> (1, 32)
    b1 = b1.astype(jnp.float32)
    b2 = b2.astype(jnp.float32)
    b3 = b3.astype(jnp.float32)

    # Weight/bias blocks use a constant index_map, so the pipeline fetches
    # them once; their (double-buffered) VMEM footprint is already accounted
    # for in the batch_tile budget above.
    full = lambda shape: pl.BlockSpec(shape, lambda i: (0, 0))

    # NOTE (optional, small-D only): for D << 128 one could pack 128//D rows
    # per "super-row" with a block-diagonal w1 to make the x stream lane-dense;
    # not applied since after the tile-size fix the kernel is HBM-bound.

    out_row = pl.pallas_call(
        mlp_kernel,
        out_shape=jax.ShapeDtypeStruct((1, B), jnp.float32),
        grid=(num_tiles,),
        in_specs=[
            pl.BlockSpec((batch_tile, D), lambda i: (i, 0)),   # x: tiled over batch
            full((D, H1)), full((1, H1)),
            full((H1, H2)), full((1, H2)),
            full((1, H2)), full((1, 1)),
        ],
        out_specs=pl.BlockSpec((1, batch_tile), lambda i: (0, i)),
        compiler_params=pltpu.CompilerParams(
            dimension_semantics=("parallel",),
            vmem_limit_bytes=48 * 1024 * 1024),
    )(x, w1, b1, w2, b2, w3_row, b3)

    # Back to the PyTorch [B, 1] layout (pure metadata at the XLA level).
    return out_row.reshape(B, 1)


def init_params(key, input_dim):
    """Deterministic init mimicking PyTorch nn.Linear defaults:
    U(-1/sqrt(fan_in), 1/sqrt(fan_in)) for both weight and bias."""
    dims = [(input_dim, 64), (64, 32), (32, 1)]
    params = {}
    for idx, (fan_in, fan_out) in enumerate(dims, start=1):
        key, kw, kb = jax.random.split(key, 3)
        bound = 1.0 / math.sqrt(fan_in)
        params[f"w{idx}"] = jax.random.uniform(
            kw, (fan_in, fan_out), jnp.float32, -bound, bound)
        params[f"b{idx}"] = jax.random.uniform(
            kb, (1, fan_out), jnp.float32, -bound, bound)
    return params


if __name__ == "__main__":
    key = jax.random.PRNGKey(0)
    key, kx = jax.random.split(key)

    batch, input_dim = 8, 16
    x = jax.random.normal(kx, (batch, input_dim), jnp.float32)
    params = init_params(key, input_dim)

    # Default path: f32 x streamed, bf16 w1, in-kernel bf16 cast, f32 accum.
    out = simple_regression_nn(x, params)
    jax.block_until_ready(out)
    assert out.shape == (batch, 1)

    # Pure-JAX reference with the same bf16 rounding of x / w1.
    xb = x.astype(jnp.bfloat16)
    w1b = params["w1"].astype(jnp.bfloat16)
    h1 = jnp.maximum(
        jnp.dot(xb, w1b, preferred_element_type=jnp.float32) + params["b1"], 0.0)
    h2 = jnp.maximum(
        jnp.dot(h1, params["w2"], preferred_element_type=jnp.float32) + params["b2"], 0.0)
    ref = jnp.dot(h2, params["w3"], preferred_element_type=jnp.float32) + params["b3"]
    assert jnp.allclose(out, ref, atol=1e-3, rtol=1e-3)

    # Full-f32 path against an exact f32 reference.
    out_f32 = simple_regression_nn(x, params, use_bf16=False)
    jax.block_until_ready(out_f32)
    h1f = jnp.maximum(x @ params["w1"] + params["b1"], 0.0)
    h2f = jnp.maximum(h1f @ params["w2"] + params["b2"], 0.0)
    ref_f32 = h2f @ params["w3"] + params["b3"]
    assert jnp.allclose(out_f32, ref_f32, atol=1e-4, rtol=1e-4)

    # Multi-tile, non-divisible batch: exercises the cdiv grid with a partial
    # last block (no wrapper-side pad) and the >=2-tile "parallel" split.
    key, kx2 = jax.random.split(key)
    batch2 = 2500
    x2 = jax.random.normal(kx2, (batch2, input_dim), jnp.float32)
    out2 = simple_regression_nn(x2, params)
    jax.block_until_ready(out2)
    assert out2.shape == (batch2, 1)
    x2b = x2.astype(jnp.bfloat16)
    g1 = jnp.maximum(
        jnp.dot(x2b, w1b, preferred_element_type=jnp.float32) + params["b1"], 0.0)
    g2 = jnp.maximum(
        jnp.dot(g1, params["w2"], preferred_element_type=jnp.float32) + params["b2"], 0.0)
    ref2 = jnp.dot(g2, params["w3"], preferred_element_type=jnp.float32) + params["b3"]
    assert jnp.allclose(out2, ref2, atol=1e-3, rtol=1e-3)

    print("KERNEL_OK")
</pallas_src>

<mosaic_0001>
module attributes {stable_mosaic.version = 11 : i64} {
  func.func @mlp_kernel(%arg0: i32, %arg1: memref<8x16xf32, #tpu.memory_space<vmem>>, %arg2: memref<16x64xbf16, #tpu.memory_space<vmem>>, %arg3: memref<1x64xf32, #tpu.memory_space<vmem>>, %arg4: memref<64x32xf32, #tpu.memory_space<vmem>>, %arg5: memref<1x32xf32, #tpu.memory_space<vmem>>, %arg6: memref<1x32xf32, #tpu.memory_space<vmem>>, %arg7: memref<1x1xf32, #tpu.memory_space<vmem>>, %arg8: memref<1x8xf32, #tpu.memory_space<vmem>>) attributes {dimension_semantics = [#tpu.dimension_semantics<parallel>], iteration_bounds = array<i64: 1>, scalar_prefetch = 0 : i64, scratch_operands = 0 : i64, tpu.core_type = #tpu.core_type<tc>, window_params = [{transform_indices = @transform_0, window_bounds = array<i64: 8, 16>}, {pipeline_mode = #tpu.pipeline_mode<synchronous>, transform_indices = @transform_1, window_bounds = array<i64: 16, 64>}, {pipeline_mode = #tpu.pipeline_mode<synchronous>, transform_indices = @transform_2, window_bounds = array<i64: 1, 64>}, {pipeline_mode = #tpu.pipeline_mode<synchronous>, transform_indices = @transform_3, window_bounds = array<i64: 64, 32>}, {pipeline_mode = #tpu.pipeline_mode<synchronous>, transform_indices = @transform_4, window_bounds = array<i64: 1, 32>}, {pipeline_mode = #tpu.pipeline_mode<synchronous>, transform_indices = @transform_5, window_bounds = array<i64: 1, 32>}, {pipeline_mode = #tpu.pipeline_mode<synchronous>, transform_indices = @transform_6, window_bounds = array<i64: 1, 1>}, {transform_indices = @transform_7, window_bounds = array<i64: 1, 8>}]} {
    %c0 = arith.constant 0 : index
    %c0_0 = arith.constant 0 : index
    %0 = vector.load %arg1[%c0, %c0_0] : memref<8x16xf32, #tpu.memory_space<vmem>>, vector<8x16xf32>
    %1 = arith.truncf %0 : vector<8x16xf32> to vector<8x16xbf16>
    %c0_1 = arith.constant 0 : index
    %c0_2 = arith.constant 0 : index
    %2 = vector.load %arg2[%c0_1, %c0_2] : memref<16x64xbf16, #tpu.memory_space<vmem>>, vector<16x64xbf16>
    %cst = arith.constant dense<0.000000e+00> : vector<8x64xf32>
    %3 = tpu.matmul %1, %2, %cst {dimension_numbers = #tpu.dot_dimension_numbers<[1], [0], [0], [1], [0, 0, 1, 1], [], []>} : vector<8x16xbf16>, vector<16x64xbf16>, vector<8x64xf32> -> vector<8x64xf32>
    %c0_3 = arith.constant 0 : index
    %c0_4 = arith.constant 0 : index
    %4 = vector.load %arg3[%c0_3, %c0_4] : memref<1x64xf32, #tpu.memory_space<vmem>>, vector<1x64xf32>
    %5 = vector.broadcast %4 : vector<1x64xf32> to vector<8x64xf32>
    %6 = arith.addf %3, %5 : vector<8x64xf32>
    %cst_5 = arith.constant 0.000000e+00 : f32
    %7 = vector.broadcast %cst_5 : f32 to vector<8x64xf32>
    %8 = arith.maximumf %6, %7 : vector<8x64xf32>
    %c0_6 = arith.constant 0 : index
    %c0_7 = arith.constant 0 : index
    %9 = vector.load %arg4[%c0_6, %c0_7] : memref<64x32xf32, #tpu.memory_space<vmem>>, vector<64x32xf32>
    %cst_8 = arith.constant dense<0.000000e+00> : vector<8x32xf32>
    %10 = tpu.matmul %8, %9, %cst_8 {dimension_numbers = #tpu.dot_dimension_numbers<[1], [0], [0], [1], [0, 0, 1, 1], [], []>} : vector<8x64xf32>, vector<64x32xf32>, vector<8x32xf32> -> vector<8x32xf32>
    %c0_9 = arith.constant 0 : index
    %c0_10 = arith.constant 0 : index
    %11 = vector.load %arg5[%c0_9, %c0_10] : memref<1x32xf32, #tpu.memory_space<vmem>>, vector<1x32xf32>
    %12 = vector.broadcast %11 : vector<1x32xf32> to vector<8x32xf32>
    %13 = arith.addf %10, %12 : vector<8x32xf32>
    %cst_11 = arith.constant 0.000000e+00 : f32
    %14 = vector.broadcast %cst_11 : f32 to vector<8x32xf32>
    %15 = arith.maximumf %13, %14 : vector<8x32xf32>
    %c0_12 = arith.constant 0 : index
    %c0_13 = arith.constant 0 : index
    %16 = vector.load %arg6[%c0_12, %c0_13] : memref<1x32xf32, #tpu.memory_space<vmem>>, vector<1x32xf32>
    %cst_14 = arith.constant dense<0.000000e+00> : vector<1x8xf32>
    %17 = tpu.matmul %16, %15, %cst_14 {dimension_numbers = #tpu.dot_dimension_numbers<[1], [1], [0], [0], [0, 0, 1, 0], [], []>} : vector<1x32xf32>, vector<8x32xf32>, vector<1x8xf32> -> vector<1x8xf32>
    %c0_15 = arith.constant 0 : index
    %c0_16 = arith.constant 0 : index
    %18 = vector.load %arg7[%c0_15, %c0_16] : memref<1x1xf32, #tpu.memory_space<vmem>>, vector<1x1xf32>
    %19 = vector.broadcast %18 : vector<1x1xf32> to vector<1x8xf32>
    %20 = arith.addf %17, %19 : vector<1x8xf32>
    %c0_17 = arith.constant 0 : index
    %c0_18 = arith.constant 0 : index
    %21 = vector.load %arg8[%c0_17, %c0_18] : memref<1x8xf32, #tpu.memory_space<vmem>>, vector<1x8xf32>
    tpu.vector_store %arg8[%c0_17, %c0_18], %20 {strides = array<i32>} : memref<1x8xf32, #tpu.memory_space<vmem>>, vector<1x8xf32>,
    return
  }
  func.func @transform_0(%arg0: i32) -> (i32, i32) {
    %c0_i32 = arith.constant 0 : i32
    %c0_i32_0 = arith.constant 0 : i32
    return %arg0, %c0_i32 : i32, i32
  }
  func.func @transform_1(%arg0: i32) -> (i32, i32) {
    %c0_i32 = arith.constant 0 : i32
    %c0_i32_0 = arith.constant 0 : i32
    %c0_i32_1 = arith.constant 0 : i32
    return %c0_i32, %c0_i32_0 : i32, i32
  }
  func.func @transform_2(%arg0: i32) -> (i32, i32) {
    %c0_i32 = arith.constant 0 : i32
    %c0_i32_0 = arith.constant 0 : i32
    %c0_i32_1 = arith.constant 0 : i32
    return %c0_i32, %c0_i32_0 : i32, i32
  }
  func.func @transform_3(%arg0: i32) -> (i32, i32) {
    %c0_i32 = arith.constant 0 : i32
    %c0_i32_0 = arith.constant 0 : i32
    %c0_i32_1 = arith.constant 0 : i32
    return %c0_i32, %c0_i32_0 : i32, i32
  }
  func.func @transform_4(%arg0: i32) -> (i32, i32) {
    %c0_i32 = arith.constant 0 : i32
    %c0_i32_0 = arith.constant 0 : i32
    %c0_i32_1 = arith.constant 0 : i32
    return %c0_i32, %c0_i32_0 : i32, i32
  }
  func.func @transform_5(%arg0: i32) -> (i32, i32) {
    %c0_i32 = arith.constant 0 : i32
    %c0_i32_0 = arith.constant 0 : i32
    %c0_i32_1 = arith.constant 0 : i32
    return %c0_i32, %c0_i32_0 : i32, i32
  }
  func.func @transform_6(%arg0: i32) -> (i32, i32) {
    %c0_i32 = arith.constant 0 : i32
    %c0_i32_0 = arith.constant 0 : i32
    %c0_i32_1 = arith.constant 0 : i32
    return %c0_i32, %c0_i32_0 : i32, i32
  }
  func.func @transform_7(%arg0: i32) -> (i32, i32) {
    %c0_i32 = arith.constant 0 : i32
    %c0_i32_0 = arith.constant 0 : i32
    return %c0_i32, %arg0 : i32, i32
  }
}

</mosaic_0001>

<bundles_post_ra>
// kernel: tpu_custom_call.1
= control target key start
LH: loop header
LB: loop body
LE: loop exit
PB: predicated region body
PF: predicated region fallthrough
CT: control target
= control target key end

     0   :  { %s481_s0 = inlined_call_operand.vmem [shape: f32[8,16], index: 0, kind: input, shape index: {}]   ;;  %s482_s1 = inlined_call_operand.vmem [shape: bf16[16,64], index: 1, kind: input, shape index: {}]   ;;  %s483_s2 = inlined_call_operand.vmem [shape: f32[1,64], index: 2, kind: input, shape index: {}]   ;;  %s484_s3 = inlined_call_operand.vmem [shape: f32[64,32], index: 3, kind: input, shape index: {}]   ;;  %s485_s4 = inlined_call_operand.vmem [shape: f32[1,32], index: 4, kind: input, shape index: {}]   ;;  %s486_s5 = inlined_call_operand.vmem [shape: f32[1,32], index: 5, kind: input, shape index: {}]   ;;  %s487_s6 = inlined_call_operand.<no memory space> [shape: f32[1,1], index: 6, kind: input, shape index: {}]   ;;  %s488_s7 = inlined_call_operand.hbm [shape: f32[1,8], index: 7, kind: output, shape index: {}]  }
   0x1   :  { %v12_v0 = vstv %s487_s6 }
   0x2   :  { %13 = vst [vmem:[#allocation2] sm:$0x1] %v12_v0 }
   0x3   :  { %v354_v1 = vld [vmem:[%s482_s1] sm:$0xff]   ;;  %v379_v2 = vmov 0.0   ;;  %v93_v5 = vld [vmem:[%s484_s3 + $0x8] sm:$0xff]  ;;  %vm380_vm0 = vmmov 0   ;;  %vm47_vm1 = vcmask 130048   ;;  %v94_v8 = vld [vmem:[%s484_s3 + $0x10] sm:$0xff] }
   0x4   :  { %306 = vmatprep.subr.bf16.mxu0 %v379_v2  ;;  %v30_v3 = vld [vmem:[%s481_s0] sm:$0xff]  ;;  %308 = vmatprep.mubr.msk.bf16.mxu0 %vm380_vm0, %v379_v2  ;;  %v95_v9 = vld [vmem:[%s484_s3 + $0x18] sm:$0xff]  ;;  %v381_v10 = vmov 0.0|0.0  }
   0x5   :  { %v92_v4 = vld [vmem:[%s484_s3] sm:$0xff]  ;;  %307 = vmatpush3.bf16.msra.mxu0 %v354_v1  ;;  %v31_v6 = vpack.c.bf16 %v30_v3, %v30_v3  ;;  %336 = vmatprep.subr.bf16.mxu1 %v381_v10 }
   0x6   :  { %v337_v7 = vpack.c.bf16 %v93_v5, %v92_v4  ;;  %328 = vmatprep.mubr.msk.f32.mxu1 %vm380_vm0, %v379_v2 }
   0x7   :  { %14 = vsyncpa [#allocation4], 0  ;;  %v340_v11 = vpack.c.bf16 %v95_v9, %v94_v8  ;;  %331 = vmatprep.subr.mxu0 %v379_v2  ;;  %v96_v12 = vld [vmem:[%s484_s3 + $0x20] sm:$0xff]  ;;  %v97_v13 = vld [vmem:[%s484_s3 + $0x28] sm:$0xff]  ;;  %vm107_vm2 = vcmask 523264   ;;  %v382_v26 = vmov 0   ;;  %v189_v33 = vlaneseq }
   0x8   :  { %338 = vmatpush3.bf16.msra.mxu1 %v337_v7  ;;  %309 = vmatmul.mubr.msk.bf16.vlgmr.msra.gmra.mrb[0].mxu0 %vm47_vm1, %v31_v6  ;;  %v343_v14 = vpack.c.bf16 %v97_v13, %v96_v12  ;;  %v98_v15 = vld [vmem:[%s484_s3 + $0x30] sm:$0xff]  ;;  %v99_v16 = vld [vmem:[%s484_s3 + $0x38] sm:$0xff]  ;;  %v286_v18 = vld [vmem:[%s483_s2] ss:$0 sm:$0xff]  ;;  %vm193_vm3 = vcmask 261120   ;;  %s383_s24 = smov [#allocation3]  }
   0x9   :  { %339 = vmatprep.subr.bf16.mxu1 %v381_v10  ;;  %333 = vmatprep.mubr.msk.f32.mxu0 %vm380_vm0, %v379_v2  ;;  %v346_v17 = vpack.c.bf16 %v99_v16, %v98_v15  ;;  %v183_v25 = vld [vmem:[#allocation2] sm:$0x1]  ;;  %v190_v34 = vshrl.u32 %v189_v33, 7  ;;  %s278_s25 = sshll.u32 %s383_s24, 4  ;;  %vm270_vm4 = vcmask 57344   ;;  %s279_s25 = int_to_ptr.vmem [resolvable:$true] %s278_s25 }
   0xa   :  { %353 = vset.pattern.permute.xlu0 %v382_v26  ;;  %v289_v27 = vld [vmem:[%s485_s4] ss:$0 sm:$0xff]  ;;  %s355_s4 = scalar_lea.vmem %s279_s25, 16  ;;  %s359_s26 = scalar_lea.vmem %s279_s25, 32 }
   0xb   :  { %186 = vperm.xlu0 %353, %v183_v25   ;;  %v182_v32 = vld [vmem:[%s486_s5] sm:$0x1]  ;;  %v191_v35 = vsub.s32 0, %v190_v34  ;;  %p356_p0 = scmp.ne.s32.totalorder %s279_s25, %s355_s4  ;;  %p360_p1 = scmp.lt.s32.totalorder %s279_s25, %s279_s25 }
   0xc   :  { %341 = vmatpush3.bf16.msra.mxu1 %v340_v11  ;;  %p361_p2 = scmp.lt.s32.totalorder %s359_s26, %s355_s4 }
   0xd   :  { %342 = vmatprep.subr.bf16.mxu1 %v381_v10 }
   0xe   :  { %p362_p3 = por %p361_p2, %p360_p1 }
  0x10   :  { %344 = vmatpush3.bf16.msra.mxu1 %v343_v14  ;;  %p363_p4 = pnand %p362_p3, %p356_p0 }
  0x11   :  { %345 = vmatprep.subr.bf16.mxu1 %v381_v10 }
  0x14   :  { %347 = vmatpush3.bf16.msra.mxu1 %v346_v17 }
  0x8a   :  { %v187_v36 = vpop.permute.xlu0 %186 }
  0x8b   :  { %v192_v37 = vrot.slane %v187_v36, %v191_v35 }
  0xdb   :  { %v85_v19 = vpop.f32.mrb[0].mxu0 }
  0xdc   :  { %v86_v20 = vadd.f32 %v286_v18, %v85_v19  ;;  %v310_v21 = vpop.f32.mrb[1].mxu0 }
  0xdd   :  { %v88_v22 = vpop.f32.mrb[2].mxu0 }
  0xde   :  { %v91_v23 = vmax.f32 %v86_v20, 0.0  ;;  %v311_v24 = vpop.f32.mrb[3].mxu0 }
  0xe0   :  { %329 = vmatmul.mubr.msk.f32.vlgmr.msra.gmra.mrb[0].mxu1 %vm107_vm2, %v91_v23 }
 0x1b3   :  { %v177_v28 = vpop.f32.mrb[0].mxu1 }
 0x1b4   :  { %v178_v29 = vadd.f32 %v289_v27, %v177_v28  ;;  %v330_v30 = vpop.f32.mrb[1].mxu1 }
 0x1b6   :  { %v181_v31 = vmax.f32 %v178_v29, 0.0 }
 0x1b8   :  { %332 = vmatpush3.xpose.msk.msra.mxu0 %vm193_vm3, %v181_v31 }
 0x1bb   :  { %334 = vmatmul.mubr.msk.f32.vlgmr.msra.gmra.mrb[4].mxu0 %vm193_vm3, %v182_v32 }
 0x28e   :  { %v266_v38 = vpop.f32.mrb[4].mxu0 }
 0x28f   :  { %v267_v39 = vadd.f32 %v266_v38, %v192_v37  ;;  %v335_v40 = vpop.f32.mrb[5].mxu0 }
 0x291   :  { %271 = vst.msk [vmem:[#allocation3] sm:$0x1] %vm270_vm4, %v267_v39 }
 0x292   :  { %366 = shalt.err (!%p363_p4)
}
 0x293   :  { %s367_s28 = scalar_lea.hbm %s488_s7, 16 }
 0x294   :  { %p368_p5 = scmp.ne.s32.totalorder %s488_s7, %s367_s28  ;;  %p371_p6 = scmp.lt.u32.totalorder %s367_s28, %s488_s7 }
 0x296   :  { %p373_p7 = pnand %p371_p6, %p368_p5 }
 0x298   :  { %376 = shalt.err (!%p373_p7)
}
 0x299   :  { %281 = dma.vmem_to_hbm [thread:$0]  %s279_s25, 16, %s488_s7, [#allocation4]  }
 0x29a   :  { %377 = dma.done.wait [#allocation4], 16  }
 0x29b   :  { %378 = vsyncadd [#allocation4], 4294967280 }
 0x29c   :  { %285 = vsyncpa [#allocation4], 1 }

</bundles_post_ra>
